<compile_context>
chip_gen: v7x
topology: tpu7x:2x2x1
jax: 0.10.0
libtpu: 0.0.40
codegen_flags: <defaults>
</compile_context>

<pallas_src>
import functools

import jax
import jax.numpy as jnp
from jax.experimental import pallas as pl
from jax.experimental.pallas import tpu as pltpu


# ---------------------------------------------------------------------------
# Fused kernel: whole forward + spectral-norm power iteration in one body.
#   refs = (u, x, w0, b0, ..., w_hid..., w_out, b_out, out, u_new)
#   weights: (Fin_p, Fout_p) bf16; biases: (1, Fout_p) f32; x: (Bp, Fin_p) f32
#   u / u_new: (1, Out_p) f32
# ---------------------------------------------------------------------------
def _fused_sn_generator_kernel(*refs, n_hidden):
    u_ref = refs[0]
    x_ref = refs[1]
    layer_refs = refs[2:2 + 2 * (n_hidden + 1)]
    o_ref = refs[-2]
    u_new_ref = refs[-1]

    x = x_ref[...]                                        # (Bp, Fin_p) f32

    # ---- hidden layers: LeakyReLU(0.2)(x @ W + b); bf16 MXU operands, f32 accum/act
    for i in range(n_hidden):
        w = layer_refs[2 * i][...]                        # (Fin_p, H_p) bf16
        b = layer_refs[2 * i + 1][...]                    # (1, H_p)     f32
        y = jnp.dot(x.astype(jnp.bfloat16), w,
                    preferred_element_type=jnp.float32) + b
        x = jnp.maximum(y, 0.2 * y)                       # LeakyReLU(0.2), single VPU max

    # ---- spectral norm power iteration on the final weight (f32 math, no transposes:
    #      broadcast-multiply + lane/sublane reductions on the XLU/VPU)
    w_out = layer_refs[2 * n_hidden][...]                 # (H_p, Out_p) bf16  (= W^T, padded)
    b_out = layer_refs[2 * n_hidden + 1][...]             # (1, Out_p)   f32
    w_out_f32 = w_out.astype(jnp.float32)
    u = u_ref[...]                                        # (1, Out_p)   f32
    eps = 1e-12
    # v = normalize(W^T u): (H_p, 1)
    v = jnp.sum(w_out_f32 * u, axis=1, keepdims=True)
    v = v / (jnp.sqrt(jnp.sum(v * v)) + eps)
    # t = W v (row), u_new = normalize(t), sigma = u_new . t
    t = jnp.sum(w_out_f32 * v, axis=0, keepdims=True)     # (1, Out_p)
    u_new = t / (jnp.sqrt(jnp.sum(t * t)) + eps)
    sigma = jnp.sum(u_new * t)
    u_new_ref[...] = u_new

    # ---- final spectrally-normalized linear + tanh (EUP)
    y = jnp.dot(x.astype(jnp.bfloat16), w_out,
                preferred_element_type=jnp.float32) * (1.0 / sigma) + b_out
    o_ref[...] = jnp.tanh(y)


def _fused_sn_generator_call(ws, bs, u_p, x_p):
    """ws[i]:(Fin_p,Fout_p) bf16, bs[i]:(1,Fout_p) f32, u_p:(1,Out_p) f32,
    x_p:(Bp,Fin_p) f32.  Returns (out:(Bp,Out_p) f32, u_new:(1,Out_p) f32)."""
    n_hidden = len(ws) - 1
    Bp = x_p.shape[0]
    Out_p = ws[-1].shape[1]

    in_specs = [
        pl.BlockSpec(u_p.shape, lambda: (0, 0)),          # power-iteration state u
        pl.BlockSpec(x_p.shape, lambda: (0, 0)),          # x (whole block, VMEM)
    ]
    args = [u_p, x_p]
    for w, b in zip(ws, bs):
        in_specs.append(pl.BlockSpec(w.shape, lambda: (0, 0)))
        in_specs.append(pl.BlockSpec(b.shape, lambda: (0, 0)))
        args += [w, b]

    out_shape = (jax.ShapeDtypeStruct((Bp, Out_p), jnp.float32),
                 jax.ShapeDtypeStruct((1, Out_p), jnp.float32))
    out_specs = (pl.BlockSpec((Bp, Out_p), lambda: (0, 0)),
                 pl.BlockSpec((1, Out_p), lambda: (0, 0)))

    # Explicit VMEM budget (all operands resident; generous headroom, capped).
    total_bytes = sum(int(a.size) * a.dtype.itemsize for a in args)
    total_bytes += (Bp * Out_p + Out_p) * 4
    vmem_limit = int(min(max(2 * total_bytes + (4 << 20), 16 << 20), 96 << 20))

    kernel = functools.partial(_fused_sn_generator_kernel, n_hidden=n_hidden)
    return pl.pallas_call(
        kernel,
        out_shape=out_shape,
        in_specs=in_specs,
        out_specs=out_specs,
        compiler_params=pltpu.CompilerParams(vmem_limit_bytes=vmem_limit),
    )(*args)


# ---------------------------------------------------------------------------
# Parameter construction (deterministic, PyTorch Linear-style init)
# ---------------------------------------------------------------------------
def _init_linear(key, in_features, out_features):
    kw, kb = jax.random.split(key)
    bound = 1.0 / jnp.sqrt(jnp.float32(in_features))
    w = jax.random.uniform(kw, (out_features, in_features), jnp.float32,
                           minval=-bound, maxval=bound)
    b = jax.random.uniform(kb, (out_features,), jnp.float32,
                           minval=-bound, maxval=bound)
    return w, b


def make_sn_generator_params(key, input_size, n_hidden, hidden_size, output_size):
    params = {"hidden": [], "u": None}
    fan_in = input_size
    for _ in range(n_hidden):
        key, sub = jax.random.split(key)
        params["hidden"].append(_init_linear(sub, fan_in, hidden_size))
        fan_in = hidden_size
    key, sub = jax.random.split(key)
    params["out"] = _init_linear(sub, hidden_size, output_size)
    key, sub = jax.random.split(key)
    u = jax.random.normal(sub, (output_size,), jnp.float32)
    params["u"] = u / (jnp.linalg.norm(u) + 1e-12)        # power-iteration state
    return params


# ---------------------------------------------------------------------------
# ONE-TIME layout prep (hoisted out of the per-call path)
# ---------------------------------------------------------------------------
def _round_up(x, m):
    return ((x + m - 1) // m) * m


def _pad_to(arr, shape):
    pads = [(0, s - d) for d, s in zip(arr.shape, shape)]
    return jnp.pad(arr, pads)


def prepare_kernel_params(params):
    """Transpose PyTorch (Fout, Fin) weights to (Fin_p, Fout_p), zero-pad feature dims
    to multiples of 128, cast weights to bf16; biases & u stay f32.  Call ONCE (at
    param creation / after each weight update), not per forward call."""
    ws, bs = [], []
    for (w, b) in params["hidden"] + [params["out"]]:
        fout, fin = w.shape
        fin_p, fout_p = _round_up(fin, 128), _round_up(fout, 128)
        ws.append(_pad_to(w.T, (fin_p, fout_p)).astype(jnp.bfloat16))
        bs.append(_pad_to(b.reshape(1, fout), (1, fout_p)).astype(jnp.float32))
    out_p = ws[-1].shape[1]
    u_p = _pad_to(params["u"].reshape(1, -1), (1, out_p)).astype(jnp.float32)
    return {"ws": ws, "bs": bs, "u_p": u_p}


# ---------------------------------------------------------------------------
# Jitted forward: pad z -> fused kernel -> slice.  Returns (out, u_new_padded);
# feed u_new_padded back as u_p on the next call (PyTorch training semantics).
# ---------------------------------------------------------------------------
def make_sn_generator_forward(output_size):
    @jax.jit
    def forward(ws, bs, u_p, z):
        B, fin = z.shape
        Bp = _round_up(max(B, 1), 16)                     # 16 sublanes (bf16-friendly)
        fin_p = ws[0].shape[0]
        x_p = jnp.zeros((Bp, fin_p), jnp.float32).at[:B, :fin].set(z.astype(jnp.float32))
        out_p, u_new_p = _fused_sn_generator_call(ws, bs, u_p, x_p)
        return out_p[:B, :output_size], u_new_p
    return forward


# ---------------------------------------------------------------------------
if __name__ == "__main__":
    input_size, n_hidden, hidden_size, output_size = 16, 2, 32, 8
    batch = 4

    key = jax.random.PRNGKey(0)
    kp, kz = jax.random.split(key)
    params = make_sn_generator_params(kp, input_size, n_hidden, hidden_size, output_size)
    z = jax.random.normal(kz, (batch, input_size), jnp.float32)

    prepared = prepare_kernel_params(params)              # hoisted, one-time
    forward = make_sn_generator_forward(output_size)

    out, u_new_p = forward(prepared["ws"], prepared["bs"], prepared["u_p"], z)
    out = jax.block_until_ready(out)
    u_new = u_new_p[0, :output_size]

    # --- reference emulating the kernel's bf16 weight/operand rounding (f32 accum) ---
    def _rnd(a):
        return a.astype(jnp.bfloat16).astype(jnp.float32)

    def ref_forward_bf16(params, z):
        eps = 1e-12
        x = z.astype(jnp.float32)
        for (w, b) in params["hidden"]:
            y = _rnd(x) @ _rnd(w).T + b
            x = jnp.maximum(y, 0.2 * y)
        w_out, b_out = params["out"]
        w_r = _rnd(w_out)
        u = params["u"]
        v = w_r.T @ u
        v = v / (jnp.linalg.norm(v) + eps)
        t = w_r @ v
        u_n = t / (jnp.linalg.norm(t) + eps)
        sigma = u_n @ t
        y = (_rnd(x) @ w_r.T) * (1.0 / sigma) + b_out
        return jnp.tanh(y), u_n

    def ref_forward_f32(params, z):
        eps = 1e-12
        x = z
        for (w, b) in params["hidden"]:
            y = x @ w.T + b
            x = jnp.maximum(y, 0.2 * y)
        w_out, b_out = params["out"]
        u = params["u"]
        v = w_out.T @ u
        v = v / (jnp.linalg.norm(v) + eps)
        t = w_out @ v
        u_n = t / (jnp.linalg.norm(t) + eps)
        sigma = u_n @ t
        return jnp.tanh((x @ w_out.T) / sigma + b_out)

    ref_out, ref_u = ref_forward_bf16(params, z)
    ref_out_f32 = ref_forward_f32(params, z)

    assert out.shape == (batch, output_size)
    assert u_new_p.shape == (1, prepared["ws"][-1].shape[1])
    assert jnp.allclose(out, ref_out, atol=5e-3, rtol=5e-3), "mismatch vs bf16-emulating ref"
    assert jnp.allclose(u_new, ref_u, atol=1e-3, rtol=1e-3), "u_new mismatch"
    assert jnp.allclose(out, ref_out_f32, atol=5e-2), "mismatch vs f32 ref (loose)"

    print("KERNEL_OK")
</pallas_src>

<mosaic_0001>
module attributes {stable_mosaic.version = 11 : i64} {
  func.func @_fused_sn_generator_kernel(%arg0: memref<1x128xf32, #tpu.memory_space<vmem>>, %arg1: memref<16x128xf32, #tpu.memory_space<vmem>>, %arg2: memref<128x128xbf16, #tpu.memory_space<vmem>>, %arg3: memref<1x128xf32, #tpu.memory_space<vmem>>, %arg4: memref<128x128xbf16, #tpu.memory_space<vmem>>, %arg5: memref<1x128xf32, #tpu.memory_space<vmem>>, %arg6: memref<128x128xbf16, #tpu.memory_space<vmem>>, %arg7: memref<1x128xf32, #tpu.memory_space<vmem>>, %arg8: memref<16x128xf32, #tpu.memory_space<vmem>>, %arg9: memref<1x128xf32, #tpu.memory_space<vmem>>) attributes {dimension_semantics = [], scalar_prefetch = 0 : i64, scratch_operands = 0 : i64, tpu.core_type = #tpu.core_type<tc>} {
    %c0 = arith.constant 0 : index
    %c0_0 = arith.constant 0 : index
    %0 = vector.load %arg1[%c0, %c0_0] : memref<16x128xf32, #tpu.memory_space<vmem>>, vector<16x128xf32>
    %c0_1 = arith.constant 0 : index
    %c0_2 = arith.constant 0 : index
    %1 = vector.load %arg2[%c0_1, %c0_2] : memref<128x128xbf16, #tpu.memory_space<vmem>>, vector<128x128xbf16>
    %c0_3 = arith.constant 0 : index
    %c0_4 = arith.constant 0 : index
    %2 = vector.load %arg3[%c0_3, %c0_4] : memref<1x128xf32, #tpu.memory_space<vmem>>, vector<1x128xf32>
    %3 = arith.truncf %0 : vector<16x128xf32> to vector<16x128xbf16>
    %cst = arith.constant dense<0.000000e+00> : vector<16x128xf32>
    %4 = tpu.matmul %3, %1, %cst {dimension_numbers = #tpu.dot_dimension_numbers<[1], [0], [0], [1], [0, 0, 1, 1], [], []>} : vector<16x128xbf16>, vector<128x128xbf16>, vector<16x128xf32> -> vector<16x128xf32>
    %5 = vector.broadcast %2 : vector<1x128xf32> to vector<16x128xf32>
    %6 = arith.addf %4, %5 : vector<16x128xf32>
    %cst_5 = arith.constant 2.000000e-01 : f32
    %7 = vector.broadcast %cst_5 : f32 to vector<16x128xf32>
    %8 = arith.mulf %7, %6 : vector<16x128xf32>
    %9 = arith.maximumf %6, %8 : vector<16x128xf32>
    %c0_6 = arith.constant 0 : index
    %c0_7 = arith.constant 0 : index
    %10 = vector.load %arg4[%c0_6, %c0_7] : memref<128x128xbf16, #tpu.memory_space<vmem>>, vector<128x128xbf16>
    %c0_8 = arith.constant 0 : index
    %c0_9 = arith.constant 0 : index
    %11 = vector.load %arg5[%c0_8, %c0_9] : memref<1x128xf32, #tpu.memory_space<vmem>>, vector<1x128xf32>
    %12 = arith.truncf %9 : vector<16x128xf32> to vector<16x128xbf16>
    %cst_10 = arith.constant dense<0.000000e+00> : vector<16x128xf32>
    %13 = tpu.matmul %12, %10, %cst_10 {dimension_numbers = #tpu.dot_dimension_numbers<[1], [0], [0], [1], [0, 0, 1, 1], [], []>} : vector<16x128xbf16>, vector<128x128xbf16>, vector<16x128xf32> -> vector<16x128xf32>
    %14 = vector.broadcast %11 : vector<1x128xf32> to vector<16x128xf32>
    %15 = arith.addf %13, %14 : vector<16x128xf32>
    %cst_11 = arith.constant 2.000000e-01 : f32
    %16 = vector.broadcast %cst_11 : f32 to vector<16x128xf32>
    %17 = arith.mulf %16, %15 : vector<16x128xf32>
    %18 = arith.maximumf %15, %17 : vector<16x128xf32>
    %c0_12 = arith.constant 0 : index
    %c0_13 = arith.constant 0 : index
    %19 = vector.load %arg6[%c0_12, %c0_13] : memref<128x128xbf16, #tpu.memory_space<vmem>>, vector<128x128xbf16>
    %c0_14 = arith.constant 0 : index
    %c0_15 = arith.constant 0 : index
    %20 = vector.load %arg7[%c0_14, %c0_15] : memref<1x128xf32, #tpu.memory_space<vmem>>, vector<1x128xf32>
    %21 = arith.extf %19 : vector<128x128xbf16> to vector<128x128xf32>
    %c0_16 = arith.constant 0 : index
    %c0_17 = arith.constant 0 : index
    %22 = vector.load %arg0[%c0_16, %c0_17] : memref<1x128xf32, #tpu.memory_space<vmem>>, vector<1x128xf32>
    %23 = vector.broadcast %22 : vector<1x128xf32> to vector<128x128xf32>
    %24 = arith.mulf %21, %23 : vector<128x128xf32>
    %cst_18 = arith.constant dense<0.000000e+00> : vector<128xf32>
    %25 = vector.multi_reduction <add>, %24, %cst_18 [1] : vector<128x128xf32> to vector<128xf32>
    %26 = vector.shape_cast %25 : vector<128xf32> to vector<128x1xf32>
    %27 = arith.mulf %26, %26 : vector<128x1xf32>
    %28 = vector.shape_cast %27 : vector<128x1xf32> to vector<1x128x1xf32>
    %cst_19 = arith.constant dense<0.000000e+00> : vector<1xf32>
    %29 = vector.multi_reduction <add>, %28, %cst_19 [1, 2] : vector<1x128x1xf32> to vector<1xf32>
    %30 = vector.shape_cast %29 : vector<1xf32> to vector<1x1x1xf32>
    %31 = vector.extract %30[0, 0, 0] : f32 from vector<1x1x1xf32>
    %32 = math.sqrt %31 : f32
    %cst_20 = arith.constant 9.99999996E-13 : f32
    %33 = arith.addf %32, %cst_20 : f32
    %34 = vector.broadcast %33 : f32 to vector<128x1xf32>
    %35 = arith.divf %26, %34 : vector<128x1xf32>
    %36 = vector.broadcast %35 : vector<128x1xf32> to vector<128x128xf32>
    %37 = arith.mulf %21, %36 : vector<128x128xf32>
    %cst_21 = arith.constant dense<0.000000e+00> : vector<128xf32>
    %38 = vector.multi_reduction <add>, %37, %cst_21 [0] : vector<128x128xf32> to vector<128xf32>
    %39 = vector.shape_cast %38 : vector<128xf32> to vector<1x128xf32>
    %40 = arith.mulf %39, %39 : vector<1x128xf32>
    %41 = vector.shape_cast %40 : vector<1x128xf32> to vector<1x1x128xf32>
    %cst_22 = arith.constant dense<0.000000e+00> : vector<1xf32>
    %42 = vector.multi_reduction <add>, %41, %cst_22 [1, 2] : vector<1x1x128xf32> to vector<1xf32>
    %43 = vector.shape_cast %42 : vector<1xf32> to vector<1x1x1xf32>
    %44 = vector.extract %43[0, 0, 0] : f32 from vector<1x1x1xf32>
    %45 = math.sqrt %44 : f32
    %cst_23 = arith.constant 9.99999996E-13 : f32
    %46 = arith.addf %45, %cst_23 : f32
    %47 = vector.broadcast %46 : f32 to vector<1x128xf32>
    %48 = arith.divf %39, %47 : vector<1x128xf32>
    %49 = arith.mulf %48, %39 : vector<1x128xf32>
    %50 = vector.shape_cast %49 : vector<1x128xf32> to vector<1x1x128xf32>
    %cst_24 = arith.constant dense<0.000000e+00> : vector<1xf32>
    %51 = vector.multi_reduction <add>, %50, %cst_24 [1, 2] : vector<1x1x128xf32> to vector<1xf32>
    %52 = vector.shape_cast %51 : vector<1xf32> to vector<1x1x1xf32>
    %53 = vector.extract %52[0, 0, 0] : f32 from vector<1x1x1xf32>
    %c0_25 = arith.constant 0 : index
    %c0_26 = arith.constant 0 : index
    %54 = vector.load %arg9[%c0_25, %c0_26] : memref<1x128xf32, #tpu.memory_space<vmem>>, vector<1x128xf32>
    tpu.vector_store %arg9[%c0_25, %c0_26], %48 {strides = array<i32>} : memref<1x128xf32, #tpu.memory_space<vmem>>, vector<1x128xf32>,
    %55 = arith.truncf %18 : vector<16x128xf32> to vector<16x128xbf16>
    %cst_27 = arith.constant dense<0.000000e+00> : vector<16x128xf32>
    %56 = tpu.matmul %55, %19, %cst_27 {dimension_numbers = #tpu.dot_dimension_numbers<[1], [0], [0], [1], [0, 0, 1, 1], [], []>} : vector<16x128xbf16>, vector<128x128xbf16>, vector<16x128xf32> -> vector<16x128xf32>
    %cst_28 = arith.constant 1.000000e+00 : f32
    %57 = arith.divf %cst_28, %53 : f32
    %58 = vector.broadcast %57 : f32 to vector<16x128xf32>
    %59 = arith.mulf %56, %58 : vector<16x128xf32>
    %60 = vector.broadcast %20 : vector<1x128xf32> to vector<16x128xf32>
    %61 = arith.addf %59, %60 : vector<16x128xf32>
    %62 = math.tanh %61 : vector<16x128xf32>
    %c0_29 = arith.constant 0 : index
    %c0_30 = arith.constant 0 : index
    %63 = vector.load %arg8[%c0_29, %c0_30] : memref<16x128xf32, #tpu.memory_space<vmem>>, vector<16x128xf32>
    tpu.vector_store %arg8[%c0_29, %c0_30], %62 {strides = array<i32>} : memref<16x128xf32, #tpu.memory_space<vmem>>, vector<16x128xf32>,
    return
  }
}

</mosaic_0001>

<bundles_post_ra>
// kernel: forward.1
= control target key start
LH: loop header
LB: loop body
LE: loop exit
PB: predicated region body
PF: predicated region fallthrough
CT: control target
= control target key end

     0   :  { %15 = vsyncpa [#allocation3], 0  ;;  %s1338_s0 = inlined_call_operand.vmem [shape: f32[1,128], index: 0, kind: input, shape index: {}]   ;;  %s1339_s1 = inlined_call_operand.vmem [shape: f32[16,128], index: 1, kind: input, shape index: {}]   ;;  %s1340_s2 = inlined_call_operand.hbm [shape: bf16[128,128], index: 2, kind: input, shape index: {}]   ;;  %s1341_s3 = inlined_call_operand.vmem [shape: f32[1,128], index: 3, kind: input, shape index: {}]   ;;  %s1342_s4 = inlined_call_operand.hbm [shape: bf16[128,128], index: 4, kind: input, shape index: {}]   ;;  %s1343_s5 = inlined_call_operand.vmem [shape: f32[1,128], index: 5, kind: input, shape index: {}]   ;;  %s1344_s6 = inlined_call_operand.hbm [shape: bf16[128,128], index: 6, kind: input, shape index: {}]   ;;  %s1345_s7 = inlined_call_operand.vmem [shape: f32[1,128], index: 7, kind: input, shape index: {}]   ;;  %s1346_s8 = inlined_call_operand.vmem [shape: f32[16,128], index: 8, kind: output, shape index: {0}]   ;;  %s1347_s9 = inlined_call_operand.hbm [shape: f32[1,128], index: 9, kind: output, shape index: {1}]  }
   0x1   :  { %16 = vsyncpa [#allocation6], 0 }
   0x2   :  { %17 = vsyncpa [#allocation4], 0  ;;  %s960_s30 = smov [#allocation5]   ;;  %s961_s11 = smov [#allocation2]  }
   0x3   :  { %s41_s10 = sshll.u32 %s960_s30, 4  ;;  %s27_s12 = sshll.u32 %s961_s11, 4  ;;  %s42_s10 = int_to_ptr.vmem [resolvable:$true] %s41_s10  ;;  %s1018_s12 = int_to_ptr.vmem [resolvable:$true] %s27_s12 }
   0x4   :  { %s866_s15 = scalar_lea.hbm %s1342_s4, 1024 }
   0x5   :  { %p867_p0 = scmp.ne.s32.totalorder %s1342_s4, %s866_s15  ;;  %p870_p1 = scmp.lt.u32.totalorder %s866_s15, %s1342_s4 }
   0x7   :  { %p872_p2 = pnand %p870_p1, %p867_p0 }
   0x9   :  { %875 = shalt.err (!%p872_p2)
}
   0xa   :  { %s876_s20 = scalar_lea.vmem %s42_s10, 1024  ;;  %p881_p4 = scmp.lt.s32.totalorder %s42_s10, %s42_s10 }
   0xb   :  { %p877_p3 = scmp.ne.s32.totalorder %s42_s10, %s876_s20  ;;  %p882_p5 = scmp.lt.s32.totalorder %s876_s20, %s876_s20 }
   0xd   :  { %p883_p6 = por %p882_p5, %p881_p4 }
   0xf   :  { %p884_p7 = pnand %p883_p6, %p877_p3 }
  0x11   :  { %887 = shalt.err (!%p884_p7)
}
  0x12   :  { %s962_s21 = smov 64   ;;  %s963_s22 = smov 4  }
  0x13   :  { %47 = dma.hbm_to_vmem [thread:$0]  %s1342_s4, 1024, %s42_s10, [#allocation6], %s962_s21, %s962_s21, %s963_s22  }
  0x14   :  { %s888_s27 = scalar_lea.hbm %s1340_s2, 1024 }
  0x15   :  { %p889_p8 = scmp.ne.s32.totalorder %s1340_s2, %s888_s27  ;;  %p892_p9 = scmp.lt.u32.totalorder %s888_s27, %s1340_s2 }
  0x17   :  { %p894_p10 = pnand %p892_p9, %p889_p8 }
  0x19   :  { %897 = shalt.err (!%p894_p10)
}
  0x1a   :  { %s898_s13 = scalar_lea.vmem %s1018_s12, 1024  ;;  %p903_p12 = scmp.lt.s32.totalorder %s1018_s12, %s1018_s12 }
  0x1b   :  { %p899_p11 = scmp.ne.s32.totalorder %s1018_s12, %s898_s13  ;;  %p904_p13 = scmp.lt.s32.totalorder %s898_s13, %s898_s13 }
  0x1d   :  { %p905_p0 = por %p904_p13, %p903_p12 }
  0x1f   :  { %p906_p1 = pnand %p905_p0, %p899_p11 }
  0x21   :  { %909 = shalt.err (!%p906_p1)
}
  0x22   :  { %33 = dma.hbm_to_vmem [thread:$0]  %s1340_s2, 1024, %s1018_s12, [#allocation3], %s962_s21, %s962_s21, %s963_s22  }
  0x23   :  { %s964_s14 = smov [#allocation7]   ;;  %s910_s18 = scalar_lea.hbm %s1344_s6, 1024 }
  0x24   :  { %s55_s15 = sshll.u32 %s964_s14, 4  ;;  %p911_p2 = scmp.ne.s32.totalorder %s1344_s6, %s910_s18  ;;  %s56_s15 = int_to_ptr.vmem [resolvable:$true] %s55_s15 }
  0x25   :  { %p914_p3 = scmp.lt.u32.totalorder %s910_s18, %s1344_s6 }
  0x27   :  { %p916_p4 = pnand %p914_p3, %p911_p2 }
  0x29   :  { %919 = shalt.err (!%p916_p4)
}
  0x2a   :  { %s920_s25 = scalar_lea.vmem %s56_s15, 1024  ;;  %p925_p6 = scmp.lt.s32.totalorder %s56_s15, %s56_s15 }
  0x2b   :  { %p921_p5 = scmp.ne.s32.totalorder %s56_s15, %s920_s25  ;;  %p926_p7 = scmp.lt.s32.totalorder %s920_s25, %s920_s25 }
  0x2d   :  { %p927_p8 = por %p926_p7, %p925_p6 }
  0x2f   :  { %p928_p9 = pnand %p927_p8, %p921_p5 }
  0x31   :  { %931 = shalt.err (!%p928_p9)
}
  0x32   :  { %61 = dma.hbm_to_vmem [thread:$0]  %s1344_s6, 1024, %s56_s15, [#allocation6], %s962_s21, %s962_s21, %s963_s22  }
  0x33   :  { %954 = dma.done.wait [#allocation3], 1024  }
  0x34   :  { %955 = vsyncadd [#allocation3], 4294966272 }
  0x35   :  { %956 = dma.done.wait [#allocation6], 2048  }
  0x36   :  { %957 = vsyncadd [#allocation6], 4294965248  ;;  %v1070_v0 = vld [vmem:[#allocation7] sm:$0xff]   ;;  %v1075_v2 = vld [vmem:[#allocation7 + $0x8] sm:$0xff]   ;;  %vm414_vm0 = vcmask 7168   ;;  %vm966_vm1 = vmmov 0  }
  0x37   :  { %v703_v1 = vld [vmem:[%s1338_s0] ss:$0 sm:$0xff]  ;;  %v327_v3 = vunpack.c.l.bf16 %v1070_v0  ;;  %v329_v4 = vunpack.c.l.bf16 %v1075_v2  ;;  %v328_v5 = vunpack.c.h.bf16 %v1070_v0  ;;  %v330_v6 = vunpack.c.h.bf16 %v1075_v2  ;;  %v1081_v7 = vld [vmem:[#allocation7 + $0x10] sm:$0xff]   ;;  %v1087_v10 = vld [vmem:[#allocation7 + $0x18] sm:$0xff]   ;;  %s967_s14 = smov [#allocation8]  }
  0x38   :  { %v331_v13 = vunpack.c.l.bf16 %v1081_v7  ;;  %v332_v14 = vunpack.c.h.bf16 %v1081_v7  ;;  %v1095_v15 = vld [vmem:[#allocation7 + $0x20] sm:$0xff]   ;;  %v333_v18 = vunpack.c.l.bf16 %v1087_v10  ;;  %v334_v19 = vunpack.c.h.bf16 %v1087_v10  ;;  %v1109_v24 = vld [vmem:[#allocation7 + $0x28] sm:$0xff]   ;;  %v1117_v29 = vld [vmem:[#allocation7 + $0x30] sm:$0xff]   ;;  %s673_s15 = sshll.u32 %s967_s14, 4  ;;  %s674_s15 = int_to_ptr.vmem [resolvable:$true] %s673_s15 }
  0x39   :  { %v350_v8 = vmul.f32 %v703_v1, %v327_v3  ;;  %v352_v9 = vmul.f32 %v703_v1, %v329_v4  ;;  %v351_v11 = vmul.f32 %v703_v1, %v328_v5  ;;  %v353_v12 = vmul.f32 %v703_v1, %v330_v6  ;;  %v1125_v34 = vld [vmem:[#allocation7 + $0x38] sm:$0xff]   ;;  %s932_s16 = scalar_lea.vmem %s674_s15, 16  ;;  %s936_s17 = scalar_lea.vmem %s674_s15, 32 }
  0x3a   :  { %v354_v16 = vmul.f32 %v703_v1, %v331_v13  ;;  %v355_v17 = vmul.f32 %v703_v1, %v332_v14  ;;  %v356_v20 = vmul.f32 %v703_v1, %v333_v18  ;;  %v357_v21 = vmul.f32 %v703_v1, %v334_v19  ;;  %p933_p10 = scmp.ne.s32.totalorder %s674_s15, %s932_s16  ;;  %p937_p11 = scmp.lt.s32.totalorder %s674_s15, %s674_s15 }
  0x3b   :  { %366 = vadd.xlane.f32.xlu0 %v350_v8  ;;  %370 = vadd.xlane.f32.xlu1 %v352_v9  ;;  %v335_v22 = vunpack.c.l.bf16 %v1095_v15  ;;  %v336_v23 = vunpack.c.h.bf16 %v1095_v15  ;;  %v337_v27 = vunpack.c.l.bf16 %v1109_v24  ;;  %v338_v28 = vunpack.c.h.bf16 %v1109_v24  ;;  %p938_p12 = scmp.lt.s32.totalorder %s936_s17, %s932_s16 }
  0x3c   :  { %v339_v32 = vunpack.c.l.bf16 %v1117_v29  ;;  %v340_v33 = vunpack.c.h.bf16 %v1117_v29  ;;  %v341_v37 = vunpack.c.l.bf16 %v1125_v34  ;;  %v342_v38 = vunpack.c.h.bf16 %v1125_v34 }
  0x3d   :  { %v358_v25 = vmul.f32 %v703_v1, %v335_v22  ;;  %v359_v26 = vmul.f32 %v703_v1, %v336_v23  ;;  %v360_v30 = vmul.f32 %v703_v1, %v337_v27  ;;  %v361_v31 = vmul.f32 %v703_v1, %v338_v28  ;;  %p939_p13 = por %p938_p12, %p937_p11 }
  0x3e   :  { %v362_v35 = vmul.f32 %v703_v1, %v339_v32  ;;  %v363_v36 = vmul.f32 %v703_v1, %v340_v33  ;;  %v364_v39 = vmul.f32 %v703_v1, %v341_v37  ;;  %v365_v40 = vmul.f32 %v703_v1, %v342_v38 }
  0x3f   :  { %368 = vadd.xlane.f32.xlu0 %v351_v11  ;;  %372 = vadd.xlane.f32.xlu1 %v353_v12  ;;  %vm521_vm4 = vcmask 1040384   ;;  %p940_p0 = pnand %p939_p13, %p933_p10 }
  0x43   :  { %374 = vadd.xlane.f32.xlu0 %v354_v16  ;;  %376 = vadd.xlane.f32.xlu1 %v355_v17 }
  0x47   :  { %378 = vadd.xlane.f32.xlu0 %v356_v20  ;;  %380 = vadd.xlane.f32.xlu1 %v357_v21 }
  0x4b   :  { %382 = vadd.xlane.f32.xlu0 %v358_v25  ;;  %384 = vadd.xlane.f32.xlu1 %v359_v26 }
  0x4f   :  { %386 = vadd.xlane.f32.xlu0 %v360_v30  ;;  %388 = vadd.xlane.f32.xlu1 %v361_v31 }
  0x53   :  { %390 = vadd.xlane.f32.xlu0 %v362_v35  ;;  %392 = vadd.xlane.f32.xlu1 %v363_v36 }
  0x57   :  { %394 = vadd.xlane.f32.xlu0 %v364_v39  ;;  %396 = vadd.xlane.f32.xlu1 %v365_v40 }
  0xc8   :  { %v1137_v41 = vpop.xlane.xlu0 %366  ;;  %v1139_v42 = vpop.xlane.xlu1 %370 }
  0xc9   :  { %v398_v43 = vmul.f32 %v1137_v41, %v1137_v41  ;;  %v400_v46 = vmul.f32 %v1139_v42, %v1139_v42 }
  0xcb   :  { %v415_v49 = vsel %vm414_vm0, %v398_v43, 0.0  ;;  %v418_v54 = vsel %vm414_vm0, %v400_v46, 0.0 }
  0xcc   :  { %v1143_v44 = vpop.xlane.xlu0 %368  ;;  %v1145_v45 = vpop.xlane.xlu1 %372 }
  0xcd   :  { %v399_v47 = vmul.f32 %v1143_v44, %v1143_v44  ;;  %v401_v48 = vmul.f32 %v1145_v45, %v1145_v45 }
  0xcf   :  { %v416_v50 = vsel %vm414_vm0, %v399_v47, 0.0  ;;  %v420_v55 = vsel %vm414_vm0, %v401_v48, 0.0 }
  0xd0   :  { %v417_v51 = vadd.f32 %v416_v50, %v415_v49  ;;  %v1155_v52 = vpop.xlane.xlu0 %374  ;;  %v1157_v53 = vpop.xlane.xlu1 %376 }
  0xd1   :  { %v402_v56 = vmul.f32 %v1155_v52, %v1155_v52  ;;  %v403_v57 = vmul.f32 %v1157_v53, %v1157_v53 }
  0xd2   :  { %v419_v58 = vadd.f32 %v418_v54, %v417_v51 }
  0xd3   :  { %v422_v59 = vsel %vm414_vm0, %v402_v56, 0.0  ;;  %v424_v63 = vsel %vm414_vm0, %v403_v57, 0.0 }
  0xd4   :  { %v421_v60 = vadd.f32 %v420_v55, %v419_v58  ;;  %v1166_v61 = vpop.xlane.xlu0 %378  ;;  %v1168_v62 = vpop.xlane.xlu1 %380 }
  0xd5   :  { %v404_v1 = vmul.f32 %v1166_v61, %v1166_v61  ;;  %v405_v8 = vmul.f32 %v1168_v62, %v1168_v62 }
  0xd6   :  { %v423_v9 = vadd.f32 %v422_v59, %v421_v60 }
  0xd7   :  { %v426_v11 = vsel %vm414_vm0, %v404_v1, 0.0  ;;  %v428_v20 = vsel %vm414_vm0, %v405_v8, 0.0 }
  0xd8   :  { %v425_v12 = vadd.f32 %v424_v63, %v423_v9  ;;  %v1176_v16 = vpop.xlane.xlu0 %382  ;;  %v1178_v17 = vpop.xlane.xlu1 %384 }
  0xd9   :  { %v406_v21 = vmul.f32 %v1176_v16, %v1176_v16  ;;  %v407_v25 = vmul.f32 %v1178_v17, %v1178_v17 }
  0xda   :  { %v427_v26 = vadd.f32 %v426_v11, %v425_v12 }
  0xdb   :  { %v430_v30 = vsel %vm414_vm0, %v406_v21, 0.0  ;;  %v432_v39 = vsel %vm414_vm0, %v407_v25, 0.0 }
  0xdc   :  { %v429_v31 = vadd.f32 %v428_v20, %v427_v26  ;;  %v1186_v35 = vpop.xlane.xlu0 %386  ;;  %v1188_v36 = vpop.xlane.xlu1 %388  ;;  %v828_v26 = vld [vmem:[#allocation2] sm:$0xff]  }
  0xdd   :  { %v408_v40 = vmul.f32 %v1186_v35, %v1186_v35  ;;  %v409_v43 = vmul.f32 %v1188_v36, %v1188_v36 }
  0xde   :  { %v431_v46 = vadd.f32 %v430_v30, %v429_v31  ;;  %v965_v30 = vmov 0.0   ;;  %v829_v31 = vld [vmem:[#allocation2 + $0x8] sm:$0xff]  }
  0xdf   :  { %v434_v47 = vsel %vm414_vm0, %v408_v40, 0.0  ;;  %v436_v51 = vsel %vm414_vm0, %v409_v43, 0.0  ;;  %740 = vmatprep.subr.bf16.mxu0 %v965_v30  ;;  %760 = vmatprep.subr.bf16.mxu1 %v965_v30  ;;  %v831_v40 = vld [vmem:[#allocation2 + $0x18] sm:$0xff]   ;;  %v832_v43 = vld [vmem:[#allocation2 + $0x20] sm:$0xff]  }
  0xe0   :  { %v433_v48 = vadd.f32 %v432_v39, %v431_v46  ;;  %v1196_v49 = vpop.xlane.xlu0 %390  ;;  %v1198_v50 = vpop.xlane.xlu1 %392  ;;  %741 = vmatpush3.bf16.msra.mxu0 %v828_v26  ;;  %v830_v39 = vld [vmem:[#allocation2 + $0x10] sm:$0xff]   ;;  %v833_v46 = vld [vmem:[#allocation2 + $0x28] sm:$0xff]   ;;  %756 = vmatprep.mubr.msk.bf16.mxu0 %vm966_vm1, %v965_v30 }
  0xe1   :  { %v410_v54 = vmul.f32 %v1196_v49, %v1196_v49  ;;  %v411_v55 = vmul.f32 %v1198_v50, %v1198_v50  ;;  %742 = vmatprep.subr.bf16.mxu0 %v965_v30  ;;  %776 = vmatprep.mubr.msk.bf16.mxu1 %vm966_vm1, %v965_v30 }
  0xe2   :  { %v435_v56 = vadd.f32 %v434_v47, %v433_v48  ;;  %v834_v47 = vld [vmem:[#allocation2 + $0x30] sm:$0xff]   ;;  %v835_v48 = vld [vmem:[#allocation2 + $0x38] sm:$0xff]  }
  0xe3   :  { %v438_v57 = vsel %vm414_vm0, %v410_v54, 0.0  ;;  %v440_v63 = vsel %vm414_vm0, %v411_v55, 0.0  ;;  %v75_v54 = vld [vmem:[%s1339_s1 + $0x8] sm:$0xff] }
  0xe4   :  { %v437_v58 = vadd.f32 %v436_v51, %v435_v56  ;;  %v1206_v59 = vpop.xlane.xlu0 %394  ;;  %v1208_v60 = vpop.xlane.xlu1 %396  ;;  %743 = vmatpush3.bf16.msra.mxu0 %v829_v31  ;;  %v74_v51 = vld [vmem:[%s1339_s1] sm:$0xff] }
  0xe5   :  { %v412_v1 = vmul.f32 %v1206_v59, %v1206_v59  ;;  %v413_v8 = vmul.f32 %v1208_v60, %v1208_v60  ;;  %744 = vmatprep.subr.bf16.mxu0 %v965_v30  ;;  %v93_v55 = vpack.c.bf16 %v75_v54, %v74_v51  ;;  %v843_v51 = vld [vmem:[#allocation5 + $0x38] sm:$0xff]  }
  0xe6   :  { %v439_v9 = vadd.f32 %v438_v57, %v437_v58 }
  0xe7   :  { %v442_v11 = vsel %vm414_vm0, %v412_v1, 0.0  ;;  %v444_v20 = vsel %vm414_vm0, %v413_v8, 0.0 }
  0xe8   :  { %v441_v12 = vadd.f32 %v440_v63, %v439_v9  ;;  %745 = vmatpush3.bf16.msra.mxu0 %v830_v39 }
  0xe9   :  { %746 = vmatprep.subr.bf16.mxu0 %v965_v30 }
  0xea   :  { %v443_v21 = vadd.f32 %v442_v11, %v441_v12  ;;  %v836_v12 = vld [vmem:[#allocation5] sm:$0xff]  }
  0xeb   :  { %761 = vmatpush3.bf16.msra.mxu1 %v836_v12 }
  0xec   :  { %v445_v25 = vadd.f32 %v444_v20, %v443_v21  ;;  %747 = vmatpush3.bf16.msra.mxu0 %v831_v40  ;;  %v837_v20 = vld [vmem:[#allocation5 + $0x8] sm:$0xff]   ;;  %762 = vmatprep.subr.bf16.mxu1 %v965_v30 }
  0xed   :  { %748 = vmatprep.subr.bf16.mxu0 %v965_v30 }
  0xee   :  { %446 = vadd.xlane.f32.xlu0 %v445_v25  ;;  %v838_v25 = vld [vmem:[#allocation5 + $0x10] sm:$0xff]  }
  0xef   :  { %763 = vmatpush3.bf16.msra.mxu1 %v837_v20 }
  0xf0   :  { %749 = vmatpush3.bf16.msra.mxu0 %v832_v43  ;;  %764 = vmatprep.subr.bf16.mxu1 %v965_v30  ;;  %v839_v43 = vld [vmem:[#allocation5 + $0x18] sm:$0xff]  }
  0xf1   :  { %750 = vmatprep.subr.bf16.mxu0 %v965_v30 }
  0xf3   :  { %765 = vmatpush3.bf16.msra.mxu1 %v838_v25 }
  0xf4   :  { %751 = vmatpush3.bf16.msra.mxu0 %v833_v46  ;;  %766 = vmatprep.subr.bf16.mxu1 %v965_v30  ;;  %v840_v46 = vld [vmem:[#allocation5 + $0x20] sm:$0xff]  }
  0xf5   :  { %752 = vmatprep.subr.bf16.mxu0 %v965_v30 }
  0xf7   :  { %767 = vmatpush3.bf16.msra.mxu1 %v839_v43 }
  0xf8   :  { %753 = vmatpush3.bf16.msra.mxu0 %v834_v47  ;;  %768 = vmatprep.subr.bf16.mxu1 %v965_v30  ;;  %v841_v47 = vld [vmem:[#allocation5 + $0x28] sm:$0xff]  }
  0xf9   :  { %754 = vmatprep.subr.bf16.mxu0 %v965_v30 }
  0xfb   :  { %769 = vmatpush3.bf16.msra.mxu1 %v840_v46 }
  0xfc   :  { %755 = vmatpush3.bf16.msra.mxu0 %v835_v48  ;;  %770 = vmatprep.subr.bf16.mxu1 %v965_v30  ;;  %v842_v48 = vld [vmem:[#allocation5 + $0x30] sm:$0xff]  }
  0xfd   :  { %780 = vmatprep.subr.bf16.mxu0 %v965_v30 }
  0xff   :  { %757 = vmatmul.mubr.bf16.vlgmr.msra.gmra.mrb[0].mxu0 %v93_v55  ;;  %771 = vmatpush3.bf16.msra.mxu1 %v841_v47 }
 0x100   :  { %781 = vmatpush3.bf16.msra.mxu0 %v1070_v0  ;;  %796 = vmatprep.mubr.msk.bf16.mxu0 %vm966_vm1, %v965_v30 }
 0x101   :  { %782 = vmatprep.subr.bf16.mxu0 %v965_v30  ;;  %772 = vmatprep.subr.bf16.mxu1 %v965_v30 }
 0x103   :  { %773 = vmatpush3.bf16.msra.mxu1 %v842_v48 }
 0x104   :  { %783 = vmatpush3.bf16.msra.mxu0 %v1075_v2  ;;  %774 = vmatprep.subr.bf16.mxu1 %v965_v30 }
 0x105   :  { %784 = vmatprep.subr.bf16.mxu0 %v965_v30 }
 0x107   :  { %775 = vmatpush3.bf16.msra.mxu1 %v843_v51 }
 0x108   :  { %785 = vmatpush3.bf16.msra.mxu0 %v1081_v7 }
 0x109   :  { %786 = vmatprep.subr.bf16.mxu0 %v965_v30 }
 0x10c   :  { %787 = vmatpush3.bf16.msra.mxu0 %v1087_v10 }
 0x10d   :  { %788 = vmatprep.subr.bf16.mxu0 %v965_v30 }
 0x110   :  { %789 = vmatpush3.bf16.msra.mxu0 %v1095_v15 }
 0x111   :  { %790 = vmatprep.subr.bf16.mxu0 %v965_v30 }
 0x114   :  { %791 = vmatpush3.bf16.msra.mxu0 %v1109_v24 }
 0x115   :  { %792 = vmatprep.subr.bf16.mxu0 %v965_v30 }
 0x118   :  { %793 = vmatpush3.bf16.msra.mxu0 %v1117_v29 }
 0x119   :  { %794 = vmatprep.subr.bf16.mxu0 %v965_v30 }
 0x11c   :  { %795 = vmatpush3.bf16.msra.mxu0 %v1125_v34 }
 0x17b   :  { %v447_v56 = vpop.xlane.xlu0 %446 }
 0x17c   :  { %v448_v57 = vrot.slane %v447_v56, 4 }
 0x17e   :  { %v449_v58 = vadd.f32 %v448_v57, %v447_v56 }
 0x180   :  { %v450_v63 = vrot.slane %v449_v58, 2 }
 0x182   :  { %v451_v1 = vadd.f32 %v450_v63, %v449_v58 }
 0x184   :  { %v452_v8 = vrot.slane %v451_v1, 1 }
 0x186   :  { %v453_v9 = vadd.f32 %v452_v8, %v451_v1 }
 0x188   :  { %800 = vpush %v453_v9 }
 0x1b9   :  { %s801_s1 = spop %800 }
 0x1ba   :  { %v455_v11 = vstv %s801_s1 }
 0x1bb   :  { %852 = vrsqrt.f32 %v455_v11  ;;  %vm458_vm2 = vcmp.eq.f32.partialorder %v455_v11, inf  ;;  %v461_v31 = vand.u32 2147483648, %v455_v11  ;;  %vm460_vm3 = vcmp.eq.f32.partialorder %v455_v11, 0.0 }
 0x1c5   :  { %v853_v21 = vpop.eup %852 }
 0x1c6   :  { %v457_v26 = vmul.f32 %v853_v21, %v455_v11 }
 0x1c8   :  { %v459_v39 = vsel %vm458_vm2, %v455_v11, %v457_v26 }
 0x1c9   :  { %v462_v40 = vsel %vm460_vm3, %v461_v31, %v459_v39 }
 0x1ca   :  { %802 = vpush %v462_v40 }
 0x1d2   :  { %v182_v20 = vpop.f32.mrb[0].mxu0 }
 0x1fb   :  { %s803_s28 = spop %802 }
 0x1fc   :  { %s464_s29 = sadd.f32 1e-12, %s803_s28 }
 0x1fe   :  { %v465_v54 = vstv %s464_s29 }
 0x1ff   :  { %854 = vrcp.f32 %v465_v54 }
 0x209   :  { %v855_v55 = vpop.eup %854 }
 0x20a   :  { %v467_v56 = vmul.f32 %v855_v55, %v1137_v41  ;;  %v468_v57 = vmul.f32 %v855_v55, %v1143_v44  ;;  %v469_v58 = vmul.f32 %v855_v55, %v1139_v42  ;;  %v470_v30 = vmul.f32 %v855_v55, %v1145_v45 }
 0x20b   :  { %v471_v8 = vmul.f32 %v855_v55, %v1155_v52  ;;  %v472_v41 = vmul.f32 %v855_v55, %v1157_v53  ;;  %v473_v12 = vmul.f32 %v855_v55, %v1166_v61  ;;  %v476_v61 = vmul.f32 %v855_v55, %v1178_v17 }
 0x20c   :  { %v483_v63 = vmul.f32 %v467_v56, %v327_v3  ;;  %v484_v1 = vmul.f32 %v468_v57, %v328_v5  ;;  %v485_v9 = vmul.f32 %v469_v58, %v329_v4  ;;  %v486_v44 = vmul.f32 %v470_v30, %v330_v6  ;;  %v685_v6 = vld [vmem:[%s1341_s3] ss:$0 sm:$0xff] }
 0x20d   :  { %v487_v0 = vmul.f32 %v471_v8, %v331_v13  ;;  %v474_v5 = vmul.f32 %v855_v55, %v1168_v62  ;;  %v488_v45 = vmul.f32 %v472_v41, %v332_v14  ;;  %v475_v4 = vmul.f32 %v855_v55, %v1176_v16 }
 0x20e   :  { %v499_v11 = vadd.f32 %v484_v1, %v483_v63  ;;  %v489_v53 = vmul.f32 %v473_v12, %v333_v18  ;;  %v477_v7 = vmul.f32 %v855_v55, %v1186_v35  ;;  %v183_v21 = vadd.f32 %v685_v6, %v182_v20  ;;  %v758_v18 = vpop.f32.mrb[1].mxu0 }
 0x20f   :  { %v490_v13 = vmul.f32 %v474_v5, %v334_v19  ;;  %v491_v14 = vmul.f32 %v475_v4, %v335_v22  ;;  %v478_v25 = vmul.f32 %v855_v55, %v1188_v36  ;;  %v185_v26 = vpop.f32.mrb[2].mxu0  ;;  %v492_v31 = vmul.f32 %v476_v61, %v336_v23 }
 0x210   :  { %v500_v42 = vadd.f32 %v499_v11, %v485_v9  ;;  %v189_v39 = vmul.f32 0.2, %v183_v21  ;;  %v186_v10 = vadd.f32 %v685_v6, %v185_v26  ;;  %v759_v19 = vpop.f32.mrb[3].mxu0  ;;  %v479_v40 = vmul.f32 %v855_v55, %v1196_v49 }
 0x211   :  { %v493_v35 = vmul.f32 %v477_v7, %v337_v27  ;;  %v480_v47 = vmul.f32 %v855_v55, %v1198_v50  ;;  %v494_v36 = vmul.f32 %v478_v25, %v338_v28  ;;  %v481_v23 = vmul.f32 %v855_v55, %v1206_v59 }
 0x212   :  { %v501_v3 = vadd.f32 %v500_v42, %v486_v44  ;;  %v191_v22 = vmax.f32 %v183_v21, %v189_v39  ;;  %v190_v46 = vmul.f32 0.2, %v186_v10  ;;  %v495_v51 = vmul.f32 %v479_v40, %v339_v32  ;;  %v694_v44 = vld [vmem:[%s1343_s5] ss:$0 sm:$0xff] }
 0x213   :  { %v482_v56 = vmul.f32 %v855_v55, %v1208_v60  ;;  %v496_v27 = vmul.f32 %v480_v47, %v340_v33  ;;  %v497_v24 = vmul.f32 %v481_v23, %v341_v37 }
 0x214   :  { %v502_v52 = vadd.f32 %v501_v3, %v487_v0  ;;  %v192_v15 = vmax.f32 %v186_v10, %v190_v46 }
 0x215   :  { %v498_v50 = vmul.f32 %v482_v56, %v342_v38 }
 0x216   :  { %v503_v2 = vadd.f32 %v502_v52, %v488_v45  ;;  %v210_v49 = vpack.c.bf16 %v192_v15, %v191_v22 }
 0x218   :  { %v504_v62 = vadd.f32 %v503_v2, %v489_v53  ;;  %777 = vmatmul.mubr.bf16.vlgmr.msra.gmra.mrb[0].mxu1 %v210_v49 }
 0x21a   :  { %v505_v16 = vadd.f32 %v504_v62, %v490_v13 }
 0x21c   :  { %v506_v17 = vadd.f32 %v505_v16, %v491_v14 }
 0x21e   :  { %v507_v43 = vadd.f32 %v506_v17, %v492_v31 }
 0x220   :  { %v508_v48 = vadd.f32 %v507_v43, %v493_v35 }
 0x222   :  { %v509_v54 = vadd.f32 %v508_v48, %v494_v36 }
 0x224   :  { %v510_v57 = vadd.f32 %v509_v54, %v495_v51 }
 0x226   :  { %v511_v28 = vadd.f32 %v510_v57, %v496_v27 }
 0x228   :  { %v512_v59 = vadd.f32 %v511_v28, %v497_v24 }
 0x22a   :  { %v513_v58 = vadd.f32 %v512_v59, %v498_v50 }
 0x22c   :  { %v514_v63 = vrot.slane %v513_v58, 4 }
 0x22e   :  { %v515_v32 = vadd.f32 %v514_v63, %v513_v58 }
 0x230   :  { %v516_v1 = vrot.slane %v515_v32, 2 }
 0x232   :  { %v517_v30 = vadd.f32 %v516_v1, %v515_v32 }
 0x234   :  { %v518_v8 = vrot.slane %v517_v30, 1 }
 0x236   :  { %v519_v60 = vadd.f32 %v518_v8, %v517_v30 }
 0x238   :  { %v520_v29 = vmul.f32 %v519_v60, %v519_v60 }
 0x23a   :  { %v522_v33 = vsel %vm521_vm4, %v520_v29, 0.0 }
 0x23b   :  { %523 = vadd.xlane.f32.xlu1 %v522_v33 }
 0x2c8   :  { %v524_v55 = vpop.xlane.xlu1 %523 }
 0x2c9   :  { %v525_v9 = vrot.slane %v524_v55, 4 }
 0x2cb   :  { %v526_v37 = vadd.f32 %v525_v9, %v524_v55 }
 0x2cd   :  { %v527_v11 = vrot.slane %v526_v37, 2 }
 0x2cf   :  { %v528_v41 = vadd.f32 %v527_v11, %v526_v37 }
 0x2d1   :  { %v529_v34 = vrot.slane %v528_v41, 1 }
 0x2d3   :  { %v530_v38 = vadd.f32 %v529_v34, %v528_v41 }
 0x2d5   :  { %804 = vpush %v530_v38 }
 0x2eb   :  { %v299_v42 = vpop.f32.mrb[0].mxu1 }
 0x2ec   :  { %v300_v12 = vadd.f32 %v694_v44, %v299_v42  ;;  %v778_v0 = vpop.f32.mrb[1].mxu1 }
 0x2ed   :  { %v302_v3 = vpop.f32.mrb[2].mxu1 }
 0x2ee   :  { %v306_v5 = vmul.f32 0.2, %v300_v12  ;;  %v303_v45 = vadd.f32 %v694_v44, %v302_v3  ;;  %v779_v52 = vpop.f32.mrb[3].mxu1 }
 0x2f0   :  { %v308_v4 = vmax.f32 %v300_v12, %v306_v5  ;;  %v307_v53 = vmul.f32 0.2, %v303_v45 }
 0x2f2   :  { %v309_v2 = vmax.f32 %v303_v45, %v307_v53 }
 0x2f4   :  { %v557_v6 = vpack.c.bf16 %v309_v2, %v308_v4 }
 0x2f6   :  { %797 = vmatmul.mubr.bf16.vlgmr.msra.gmra.mrb[4].mxu0 %v557_v6 }
 0x306   :  { %s805_s4 = spop %804 }
 0x307   :  { %v532_v61 = vstv %s805_s4 }
 0x308   :  { %856 = vrsqrt.f32 %v532_v61  ;;  %vm535_vm5 = vcmp.eq.f32.partialorder %v532_v61, inf  ;;  %v538_v20 = vand.u32 2147483648, %v532_v61  ;;  %vm537_vm6 = vcmp.eq.f32.partialorder %v532_v61, 0.0 }
 0x312   :  { %v857_v13 = vpop.eup %856 }
 0x313   :  { %v534_v62 = vmul.f32 %v857_v13, %v532_v61 }
 0x315   :  { %v536_v7 = vsel %vm535_vm5, %v532_v61, %v534_v62 }
 0x316   :  { %v539_v14 = vsel %vm537_vm6, %v538_v20, %v536_v7 }
 0x317   :  { %806 = vpush %v539_v14 }
 0x348   :  { %s807_s5 = spop %806 }
 0x349   :  { %s541_s10 = sadd.f32 1e-12, %s807_s5 }
 0x34b   :  { %v542_v16 = vstv %s541_s10 }
 0x34c   :  { %858 = vrcp.f32 %v542_v16 }
 0x356   :  { %v859_v21 = vpop.eup %858 }
 0x357   :  { %v544_v18 = vmul.f32 %v859_v21, %v519_v60 }
 0x359   :  { %v545_v25 = vmul.f32 %v544_v18, %v519_v60  ;;  %556 = vst [vmem:[#allocation8] sm:$0x1] %v544_v18 }
 0x35b   :  { %v546_v26 = vsel %vm521_vm4, %v545_v25, 0.0 }
 0x35c   :  { %547 = vadd.xlane.f32.xlu0 %v546_v26 }
 0x3c9   :  { %v640_v31 = vpop.f32.mrb[4].mxu0 }
 0x3ca   :  { %v798_v17 = vpop.f32.mrb[5].mxu0 }
 0x3cb   :  { %v643_v39 = vpop.f32.mrb[6].mxu0 }
 0x3cc   :  { %v799_v10 = vpop.f32.mrb[7].mxu0 }
 0x3e9   :  { %v548_v19 = vpop.xlane.xlu0 %547 }
 0x3ea   :  { %v549_v40 = vrot.slane %v548_v19, 4 }
 0x3ec   :  { %v550_v35 = vadd.f32 %v549_v40, %v548_v19 }
 0x3ee   :  { %v551_v43 = vrot.slane %v550_v35, 2 }
 0x3f0   :  { %v552_v22 = vadd.f32 %v551_v43, %v550_v35 }
 0x3f2   :  { %v553_v46 = vrot.slane %v552_v22, 1 }
 0x3f4   :  { %v554_v47 = vadd.f32 %v553_v46, %v552_v22 }
 0x3f6   :  { %808 = vpush %v554_v47 }
 0x3f7   :  { %943 = shalt.err (!%p940_p0)
}
 0x3f8   :  { %s944_s20 = scalar_lea.hbm %s1347_s9, 16 }
 0x3f9   :  { %p945_p1 = scmp.ne.s32.totalorder %s1347_s9, %s944_s20  ;;  %p948_p2 = scmp.lt.u32.totalorder %s944_s20, %s1347_s9 }
 0x3fb   :  { %p950_p3 = pnand %p948_p2, %p945_p1 }
 0x3fd   :  { %953 = shalt.err (!%p950_p3)
}
 0x3fe   :  { %676 = dma.vmem_to_hbm [thread:$0]  %s674_s15, 16, %s1347_s9, [#allocation4]   ;;  %v712_v15 = vld [vmem:[%s1345_s7] ss:$0 sm:$0xff] }
 0x427   :  { %s809_s27 = spop %808 }
 0x428   :  { %v647_v36 = vstv %s809_s27 }
 0x429   :  { %860 = vrcp.f32 %v647_v36 }
 0x433   :  { %v861_v48 = vpop.eup %860 }
 0x434   :  { %810 = vpush %v861_v48 }
 0x465   :  { %s811_s0 = spop %810 }
 0x466   :  { %v650_v23 = vstv %s811_s0 }
 0x467   :  { %v651_v51 = vmul.f32 %v650_v23, %v640_v31  ;;  %v652_v54 = vmul.f32 %v650_v23, %v643_v39 }
 0x469   :  { %v659_v49 = vadd.f32 %v712_v15, %v651_v51  ;;  %v660_v56 = vadd.f32 %v712_v15, %v652_v54 }
 0x46b   :  { %862 = vtanh.f32 %v659_v49 }
 0x46c   :  { %864 = vtanh.f32 %v660_v56 }
 0x475   :  { %v863_v27 = vpop.eup %862 }
 0x476   :  { %v865_v57 = vpop.eup %864  ;;  %663 = vst [vmem:[%s1346_s8] sm:$0xff] %v863_v27 }
 0x477   :  { %664 = vst [vmem:[%s1346_s8 + $0x8] sm:$0xff] %v865_v57 }
 0x478   :  { %958 = dma.done.wait [#allocation4], 16  }
 0x479   :  { %959 = vsyncadd [#allocation4], 4294967280 }
 0x47a   :  { %682 = vsyncpa [#allocation3], 1 }
 0x47b   :  { %683 = vsyncpa [#allocation6], 1 }
 0x47c   :  { %684 = vsyncpa [#allocation4], 1 }

</bundles_post_ra>
